<compile_context>
chip_gen: v7x
topology: tpu7x:2x2x1
jax: 0.10.0
libtpu: 0.0.40
codegen_flags: <defaults>
</compile_context>

<pallas_src>
import jax
import jax.numpy as jnp
from jax import lax
from jax.experimental import pallas as pl
from jax.experimental.pallas import tpu as pltpu


def _make_lstm_kernel(T, BP, H, VP):
    """Kernel factory; T, BP (padded batch), H, VP (padded vocab) are static."""
    G = 4 * H

    def kernel(ids_ref, emb_ref, wih_ref, whh_ref, b_ref, wln_ref, bln_ref,
               out_ref, xg_scr, hall_scr):
        # (0) Embedding lookup fused in-kernel as an exact one-hot matmul:
        #     onehot(ids) @ E  ==  E[ids]   (selects rows with *1.0 / +0.0).
        vocab_lane = lax.broadcasted_iota(jnp.int32, (T * BP, VP), 1)
        onehot = (ids_ref[...] == vocab_lane).astype(jnp.float32)   # (T*BP, VP)
        x = jnp.dot(onehot, emb_ref[...],
                    preferred_element_type=jnp.float32)             # (T*BP, H)

        # (1) Hoisted input projection for ALL timesteps in one MXU matmul:
        #     xg = X @ W_ih^T + (b_ih + b_hh)                       -> (T*BP, 4H)
        xg_scr[...] = (jnp.dot(x, wih_ref[...],
                               preferred_element_type=jnp.float32)
                       + b_ref[...])

        # Lane mask selecting the g-gate lanes [2H, 3H) of the (BP, 4H) vreg.
        lane = lax.broadcasted_iota(jnp.int32, (BP, G), 1)
        is_g = (lane >= 2 * H) & (lane < 3 * H)

        def step(t, carry):
            h_prev, c_prev = carry
            base = pl.multiple_of(t * BP, BP)            # sublane-aligned start

            # Only the recurrent matmul stays on the serial path.
            gates = xg_scr[pl.ds(base, BP), :] + jnp.dot(
                h_prev, whh_ref[...], preferred_element_type=jnp.float32)

            # Two full-vreg activation passes + one VPU select, then cheap
            # static lane slices to recombine (minor at H=32).
            act = jnp.where(is_g, jnp.tanh(gates), jax.nn.sigmoid(gates))
            i_g = act[:, 0 * H:1 * H]
            f_g = act[:, 1 * H:2 * H]
            g_g = act[:, 2 * H:3 * H]
            o_g = act[:, 3 * H:4 * H]

            c_new = f_g * c_prev + i_g * g_g
            h_new = o_g * jnp.tanh(c_new)

            # Stash h_t for the batched output projection after the loop.
            hall_scr[pl.ds(base, BP), :] = h_new
            return (h_new, c_new)

        h0 = jnp.zeros((BP, H), jnp.float32)
        c0 = jnp.zeros((BP, H), jnp.float32)
        lax.fori_loop(0, T, step, (h0, c0), unroll=True)

        # (2) Batched, lane-dense output projection: one (T*BP,H)@(H,PP) matmul
        #     and a single unmasked, full-lane store.
        out_ref[...] = (jnp.dot(hall_scr[...], wln_ref[...],
                                preferred_element_type=jnp.float32)
                        + bln_ref[...])

    return kernel


def my_lstm_forward(x_ids, params):
    """x_ids: (T, B) int32 token ids.  Returns (T, B, posn) float32."""
    emb = params["embedding"]                 # (vocsize, H)
    w_ih = params["w_ih"]                     # (4H, H)  PyTorch order [i,f,g,o]
    w_hh = params["w_hh"]                     # (4H, H)
    b_ih = params["b_ih"]                     # (4H,)
    b_hh = params["b_hh"]                     # (4H,)
    w_ln = params["w_ln"]                     # (posn, H)
    b_ln = params["b_ln"]                     # (posn,)

    T, B = x_ids.shape
    V, H = emb.shape
    P = w_ln.shape[0]

    BP = ((B + 7) // 8) * 8                   # pad batch to sublane width (8)
    PP = ((P + 127) // 128) * 128             # pad output to full lane width
    VP = ((V + 127) // 128) * 128             # pad vocab to full lane width

    # Token ids, batch-padded with id 0 (padded rows are sliced off at the end).
    ids = jnp.pad(x_ids.astype(jnp.int32), ((0, 0), (0, BP - B)))
    ids = ids.reshape(T * BP, 1)                                     # (T*BP, 1)

    # Pre-transpose / zero-pad weights for row-major, lane-dense matmuls.
    emb_p = jnp.pad(emb.astype(jnp.float32), ((0, VP - V), (0, 0)))  # (VP, H)
    wih_t = jnp.transpose(w_ih)                                      # (H, 4H)
    whh_t = jnp.transpose(w_hh)                                      # (H, 4H)
    b_sum = (b_ih + b_hh).reshape(1, 4 * H)                          # (1, 4H)
    wln_t = jnp.pad(jnp.transpose(w_ln), ((0, 0), (0, PP - P)))      # (H, PP)
    bln2 = jnp.pad(b_ln, (0, PP - P)).reshape(1, PP)                 # (1, PP)

    grid_spec = pltpu.PrefetchScalarGridSpec(
        num_scalar_prefetch=0,
        grid=(1,),                                   # whole sequence, one step
        in_specs=[
            pl.BlockSpec((T * BP, 1), lambda i: (0, 0)),     # token ids
            pl.BlockSpec((VP, H), lambda i: (0, 0)),         # embedding table
            pl.BlockSpec((H, 4 * H), lambda i: (0, 0)),      # W_ih^T (resident)
            pl.BlockSpec((H, 4 * H), lambda i: (0, 0)),      # W_hh^T (resident)
            pl.BlockSpec((1, 4 * H), lambda i: (0, 0)),      # b_ih + b_hh
            pl.BlockSpec((H, PP), lambda i: (0, 0)),         # W_ln^T (lane-padded)
            pl.BlockSpec((1, PP), lambda i: (0, 0)),         # b_ln (lane-padded)
        ],
        out_specs=pl.BlockSpec((T * BP, PP), lambda i: (0, 0)),
        scratch_shapes=[
            pltpu.VMEM((T * BP, 4 * H), jnp.float32),        # hoisted gate pre-acts
            pltpu.VMEM((T * BP, H), jnp.float32),            # all h_t for out-proj
        ],
    )

    out2d = pl.pallas_call(
        _make_lstm_kernel(T, BP, H, VP),
        out_shape=jax.ShapeDtypeStruct((T * BP, PP), jnp.float32),
        grid_spec=grid_spec,
        compiler_params=pltpu.CompilerParams(
            dimension_semantics=("arbitrary",)),   # recurrence -> sequential
    )(ids, emb_p, wih_t, whh_t, b_sum, wln_t, bln2)

    # Drop batch / output-lane padding.
    return out2d.reshape(T, BP, PP)[:, :B, :P]


def reference_forward(x_ids, params):
    """Pure-JAX reference matching PyTorch MyLSTM.forward semantics."""
    emb = params["embedding"]
    w_ih, w_hh = params["w_ih"], params["w_hh"]
    b_ih, b_hh = params["b_ih"], params["b_hh"]
    w_ln, b_ln = params["w_ln"], params["b_ln"]
    H = emb.shape[1]

    x_emb = jnp.take(emb, x_ids, axis=0).astype(jnp.float32)    # (T, B, H)
    B = x_emb.shape[1]
    h0 = jnp.zeros((B, H), jnp.float32)
    c0 = jnp.zeros((B, H), jnp.float32)

    def step(carry, x_t):
        h, c = carry
        gates = x_t @ w_ih.T + b_ih + h @ w_hh.T + b_hh
        i_g = jax.nn.sigmoid(gates[:, 0 * H:1 * H])
        f_g = jax.nn.sigmoid(gates[:, 1 * H:2 * H])
        g_g = jnp.tanh(gates[:, 2 * H:3 * H])
        o_g = jax.nn.sigmoid(gates[:, 3 * H:4 * H])
        c_new = f_g * c + i_g * g_g
        h_new = o_g * jnp.tanh(c_new)
        return (h_new, c_new), h_new

    _, lo = lax.scan(step, (h0, c0), x_emb)                     # (T, B, H)
    return lo @ w_ln.T + b_ln                                   # (T, B, posn)


def init_params(key, vocsize, posn, hdim):
    ks = jax.random.split(key, 7)
    bound = 1.0 / jnp.sqrt(hdim)
    u = lambda k, shape: jax.random.uniform(k, shape, jnp.float32, -bound, bound)
    return {
        "embedding": jax.random.normal(ks[0], (vocsize, hdim), jnp.float32),
        "w_ih": u(ks[1], (4 * hdim, hdim)),
        "w_hh": u(ks[2], (4 * hdim, hdim)),
        "b_ih": u(ks[3], (4 * hdim,)),
        "b_hh": u(ks[4], (4 * hdim,)),
        "w_ln": u(ks[5], (posn, hdim)),
        "b_ln": u(ks[6], (posn,)),
    }


if __name__ == "__main__":
    vocsize, posn, hdim = 50, 16, 32
    seq_len, batch = 8, 2

    key = jax.random.PRNGKey(0)
    pkey, xkey = jax.random.split(key)
    params = init_params(pkey, vocsize, posn, hdim)
    x_ids = jax.random.randint(xkey, (seq_len, batch), 0, vocsize, jnp.int32)

    out = my_lstm_forward(x_ids, params)
    out = jax.block_until_ready(out)

    ref = jax.block_until_ready(reference_forward(x_ids, params))
    assert out.shape == (seq_len, batch, posn)
    assert jnp.max(jnp.abs(out - ref)) < 1e-4, "mismatch vs pure-JAX reference"

    print("KERNEL_OK")
</pallas_src>

<mosaic_0001>
module attributes {stable_mosaic.version = 11 : i64} {
  func.func @kernel(%arg0: i32, %arg1: memref<64x1xi32, #tpu.memory_space<vmem>>, %arg2: memref<128x32xf32, #tpu.memory_space<vmem>>, %arg3: memref<32x128xf32, #tpu.memory_space<vmem>>, %arg4: memref<32x128xf32, #tpu.memory_space<vmem>>, %arg5: memref<1x128xf32, #tpu.memory_space<vmem>>, %arg6: memref<32x128xf32, #tpu.memory_space<vmem>>, %arg7: memref<1x128xf32, #tpu.memory_space<vmem>>, %arg8: memref<64x128xf32, #tpu.memory_space<vmem>>, %arg9: memref<64x128xf32, #tpu.memory_space<vmem>>, %arg10: memref<64x32xf32, #tpu.memory_space<vmem>>) attributes {dimension_semantics = [#tpu.dimension_semantics<arbitrary>], iteration_bounds = array<i64: 1>, scalar_prefetch = 0 : i64, scratch_operands = 2 : i64, tpu.core_type = #tpu.core_type<tc>, window_params = [{pipeline_mode = #tpu.pipeline_mode<synchronous>, transform_indices = @transform_0, window_bounds = array<i64: 64, 1>}, {pipeline_mode = #tpu.pipeline_mode<synchronous>, transform_indices = @transform_1, window_bounds = array<i64: 128, 32>}, {pipeline_mode = #tpu.pipeline_mode<synchronous>, transform_indices = @transform_2, window_bounds = array<i64: 32, 128>}, {pipeline_mode = #tpu.pipeline_mode<synchronous>, transform_indices = @transform_3, window_bounds = array<i64: 32, 128>}, {pipeline_mode = #tpu.pipeline_mode<synchronous>, transform_indices = @transform_4, window_bounds = array<i64: 1, 128>}, {pipeline_mode = #tpu.pipeline_mode<synchronous>, transform_indices = @transform_5, window_bounds = array<i64: 32, 128>}, {pipeline_mode = #tpu.pipeline_mode<synchronous>, transform_indices = @transform_6, window_bounds = array<i64: 1, 128>}, {pipeline_mode = #tpu.pipeline_mode<synchronous>, transform_indices = @transform_7, window_bounds = array<i64: 64, 128>}]} {
    %0 = tpu.iota {dimensions = array<i32: 1>} : vector<64x128xi32>
    %c0 = arith.constant 0 : index
    %c0_0 = arith.constant 0 : index
    %1 = vector.load %arg1[%c0, %c0_0] : memref<64x1xi32, #tpu.memory_space<vmem>>, vector<64x1xi32>
    %2 = vector.broadcast %1 : vector<64x1xi32> to vector<64x128xi32>
    %3 = arith.cmpi eq, %2, %0 : vector<64x128xi32>
    %4 = arith.extui %3 : vector<64x128xi1> to vector<64x128xi32>
    %5 = arith.sitofp %4 : vector<64x128xi32> to vector<64x128xf32>
    %c0_1 = arith.constant 0 : index
    %c0_2 = arith.constant 0 : index
    %6 = vector.load %arg2[%c0_1, %c0_2] : memref<128x32xf32, #tpu.memory_space<vmem>>, vector<128x32xf32>
    %cst = arith.constant dense<0.000000e+00> : vector<64x32xf32>
    %7 = tpu.matmul %5, %6, %cst {dimension_numbers = #tpu.dot_dimension_numbers<[1], [0], [0], [1], [0, 0, 1, 1], [], []>} : vector<64x128xf32>, vector<128x32xf32>, vector<64x32xf32> -> vector<64x32xf32>
    %c0_3 = arith.constant 0 : index
    %c0_4 = arith.constant 0 : index
    %8 = vector.load %arg3[%c0_3, %c0_4] : memref<32x128xf32, #tpu.memory_space<vmem>>, vector<32x128xf32>
    %cst_5 = arith.constant dense<0.000000e+00> : vector<64x128xf32>
    %9 = tpu.matmul %7, %8, %cst_5 {dimension_numbers = #tpu.dot_dimension_numbers<[1], [0], [0], [1], [0, 0, 1, 1], [], []>} : vector<64x32xf32>, vector<32x128xf32>, vector<64x128xf32> -> vector<64x128xf32>
    %c0_6 = arith.constant 0 : index
    %c0_7 = arith.constant 0 : index
    %10 = vector.load %arg5[%c0_6, %c0_7] : memref<1x128xf32, #tpu.memory_space<vmem>>, vector<1x128xf32>
    %11 = vector.broadcast %10 : vector<1x128xf32> to vector<64x128xf32>
    %12 = arith.addf %9, %11 : vector<64x128xf32>
    %c0_8 = arith.constant 0 : index
    %c0_9 = arith.constant 0 : index
    %13 = vector.load %arg9[%c0_8, %c0_9] : memref<64x128xf32, #tpu.memory_space<vmem>>, vector<64x128xf32>
    tpu.vector_store %arg9[%c0_8, %c0_9], %12 {strides = array<i32>} : memref<64x128xf32, #tpu.memory_space<vmem>>, vector<64x128xf32>,
    %14 = tpu.iota {dimensions = array<i32: 1>} : vector<8x128xi32>
    %c64_i32 = arith.constant 64 : i32
    %15 = vector.broadcast %c64_i32 : i32 to vector<8x128xi32>
    %16 = arith.cmpi sge, %14, %15 : vector<8x128xi32>
    %c96_i32 = arith.constant 96 : i32
    %17 = vector.broadcast %c96_i32 : i32 to vector<8x128xi32>
    %18 = arith.cmpi slt, %14, %17 : vector<8x128xi32>
    %19 = arith.andi %16, %18 : vector<8x128xi1>
    %cst_10 = arith.constant 0.000000e+00 : f32
    %20 = vector.broadcast %cst_10 : f32 to vector<8x32xf32>
    %cst_11 = arith.constant 0.000000e+00 : f32
    %21 = vector.broadcast %cst_11 : f32 to vector<8x32xf32>
    %c0_i32 = arith.constant 0 : i32
    %c8_i32 = arith.constant 8 : i32
    %22 = arith.muli %c0_i32, %c8_i32 : i32
    %23 = tpu.assume_multiple %22, 8 : i32
    %24 = arith.index_cast %23 : i32 to index
    %c0_12 = arith.constant 0 : index
    %25 = vector.load %arg9[%24, %c0_12] : memref<64x128xf32, #tpu.memory_space<vmem>>, vector<8x128xf32>
    %c0_13 = arith.constant 0 : index
    %c0_14 = arith.constant 0 : index
    %26 = vector.load %arg4[%c0_13, %c0_14] : memref<32x128xf32, #tpu.memory_space<vmem>>, vector<32x128xf32>
    %cst_15 = arith.constant dense<0.000000e+00> : vector<8x128xf32>
    %27 = tpu.matmul %20, %26, %cst_15 {dimension_numbers = #tpu.dot_dimension_numbers<[1], [0], [0], [1], [0, 0, 1, 1], [], []>} : vector<8x32xf32>, vector<32x128xf32>, vector<8x128xf32> -> vector<8x128xf32>
    %28 = arith.addf %25, %27 : vector<8x128xf32>
    %29 = math.tanh %28 : vector<8x128xf32>
    %30 = arith.negf %28 : vector<8x128xf32>
    %31 = math.exp %30 : vector<8x128xf32>
    %cst_16 = arith.constant 1.000000e+00 : f32
    %32 = vector.broadcast %cst_16 : f32 to vector<8x128xf32>
    %33 = arith.addf %32, %31 : vector<8x128xf32>
    %34 = arith.divf %32, %33 : vector<8x128xf32>
    %35 = arith.select %19, %29, %34 : vector<8x128xi1>, vector<8x128xf32>
    %36 = vector.extract_strided_slice %35 {offsets = [0, 0], sizes = [8, 32], strides = [1, 1]} : vector<8x128xf32> to vector<8x32xf32>
    %37 = vector.extract_strided_slice %35 {offsets = [0, 32], sizes = [8, 32], strides = [1, 1]} : vector<8x128xf32> to vector<8x32xf32>
    %38 = vector.extract_strided_slice %35 {offsets = [0, 64], sizes = [8, 32], strides = [1, 1]} : vector<8x128xf32> to vector<8x32xf32>
    %39 = vector.extract_strided_slice %35 {offsets = [0, 96], sizes = [8, 32], strides = [1, 1]} : vector<8x128xf32> to vector<8x32xf32>
    %40 = arith.mulf %37, %21 : vector<8x32xf32>
    %41 = arith.mulf %36, %38 : vector<8x32xf32>
    %42 = arith.addf %40, %41 : vector<8x32xf32>
    %43 = math.tanh %42 : vector<8x32xf32>
    %44 = arith.mulf %39, %43 : vector<8x32xf32>
    %45 = arith.index_cast %23 : i32 to index
    %c0_17 = arith.constant 0 : index
    %46 = vector.load %arg10[%45, %c0_17] : memref<64x32xf32, #tpu.memory_space<vmem>>, vector<8x32xf32>
    tpu.vector_store %arg10[%45, %c0_17], %44 {strides = array<i32>} : memref<64x32xf32, #tpu.memory_space<vmem>>, vector<8x32xf32>,
    %c1_i32 = arith.constant 1 : i32
    %c8_i32_18 = arith.constant 8 : i32
    %47 = arith.muli %c1_i32, %c8_i32_18 : i32
    %48 = tpu.assume_multiple %47, 8 : i32
    %49 = arith.index_cast %48 : i32 to index
    %c0_19 = arith.constant 0 : index
    %50 = vector.load %arg9[%49, %c0_19] : memref<64x128xf32, #tpu.memory_space<vmem>>, vector<8x128xf32>
    %c0_20 = arith.constant 0 : index
    %c0_21 = arith.constant 0 : index
    %51 = vector.load %arg4[%c0_20, %c0_21] : memref<32x128xf32, #tpu.memory_space<vmem>>, vector<32x128xf32>
    %cst_22 = arith.constant dense<0.000000e+00> : vector<8x128xf32>
    %52 = tpu.matmul %44, %51, %cst_22 {dimension_numbers = #tpu.dot_dimension_numbers<[1], [0], [0], [1], [0, 0, 1, 1], [], []>} : vector<8x32xf32>, vector<32x128xf32>, vector<8x128xf32> -> vector<8x128xf32>
    %53 = arith.addf %50, %52 : vector<8x128xf32>
    %54 = math.tanh %53 : vector<8x128xf32>
    %55 = arith.negf %53 : vector<8x128xf32>
    %56 = math.exp %55 : vector<8x128xf32>
    %cst_23 = arith.constant 1.000000e+00 : f32
    %57 = vector.broadcast %cst_23 : f32 to vector<8x128xf32>
    %58 = arith.addf %57, %56 : vector<8x128xf32>
    %59 = arith.divf %57, %58 : vector<8x128xf32>
    %60 = arith.select %19, %54, %59 : vector<8x128xi1>, vector<8x128xf32>
    %61 = vector.extract_strided_slice %60 {offsets = [0, 0], sizes = [8, 32], strides = [1, 1]} : vector<8x128xf32> to vector<8x32xf32>
    %62 = vector.extract_strided_slice %60 {offsets = [0, 32], sizes = [8, 32], strides = [1, 1]} : vector<8x128xf32> to vector<8x32xf32>
    %63 = vector.extract_strided_slice %60 {offsets = [0, 64], sizes = [8, 32], strides = [1, 1]} : vector<8x128xf32> to vector<8x32xf32>
    %64 = vector.extract_strided_slice %60 {offsets = [0, 96], sizes = [8, 32], strides = [1, 1]} : vector<8x128xf32> to vector<8x32xf32>
    %65 = arith.mulf %62, %42 : vector<8x32xf32>
    %66 = arith.mulf %61, %63 : vector<8x32xf32>
    %67 = arith.addf %65, %66 : vector<8x32xf32>
    %68 = math.tanh %67 : vector<8x32xf32>
    %69 = arith.mulf %64, %68 : vector<8x32xf32>
    %70 = arith.index_cast %48 : i32 to index
    %c0_24 = arith.constant 0 : index
    %71 = vector.load %arg10[%70, %c0_24] : memref<64x32xf32, #tpu.memory_space<vmem>>, vector<8x32xf32>
    tpu.vector_store %arg10[%70, %c0_24], %69 {strides = array<i32>} : memref<64x32xf32, #tpu.memory_space<vmem>>, vector<8x32xf32>,
    %c2_i32 = arith.constant 2 : i32
    %c8_i32_25 = arith.constant 8 : i32
    %72 = arith.muli %c2_i32, %c8_i32_25 : i32
    %73 = tpu.assume_multiple %72, 8 : i32
    %74 = arith.index_cast %73 : i32 to index
    %c0_26 = arith.constant 0 : index
    %75 = vector.load %arg9[%74, %c0_26] : memref<64x128xf32, #tpu.memory_space<vmem>>, vector<8x128xf32>
    %c0_27 = arith.constant 0 : index
    %c0_28 = arith.constant 0 : index
    %76 = vector.load %arg4[%c0_27, %c0_28] : memref<32x128xf32, #tpu.memory_space<vmem>>, vector<32x128xf32>
    %cst_29 = arith.constant dense<0.000000e+00> : vector<8x128xf32>
    %77 = tpu.matmul %69, %76, %cst_29 {dimension_numbers = #tpu.dot_dimension_numbers<[1], [0], [0], [1], [0, 0, 1, 1], [], []>} : vector<8x32xf32>, vector<32x128xf32>, vector<8x128xf32> -> vector<8x128xf32>
    %78 = arith.addf %75, %77 : vector<8x128xf32>
    %79 = math.tanh %78 : vector<8x128xf32>
    %80 = arith.negf %78 : vector<8x128xf32>
    %81 = math.exp %80 : vector<8x128xf32>
    %cst_30 = arith.constant 1.000000e+00 : f32
    %82 = vector.broadcast %cst_30 : f32 to vector<8x128xf32>
    %83 = arith.addf %82, %81 : vector<8x128xf32>
    %84 = arith.divf %82, %83 : vector<8x128xf32>
    %85 = arith.select %19, %79, %84 : vector<8x128xi1>, vector<8x128xf32>
    %86 = vector.extract_strided_slice %85 {offsets = [0, 0], sizes = [8, 32], strides = [1, 1]} : vector<8x128xf32> to vector<8x32xf32>
    %87 = vector.extract_strided_slice %85 {offsets = [0, 32], sizes = [8, 32], strides = [1, 1]} : vector<8x128xf32> to vector<8x32xf32>
    %88 = vector.extract_strided_slice %85 {offsets = [0, 64], sizes = [8, 32], strides = [1, 1]} : vector<8x128xf32> to vector<8x32xf32>
    %89 = vector.extract_strided_slice %85 {offsets = [0, 96], sizes = [8, 32], strides = [1, 1]} : vector<8x128xf32> to vector<8x32xf32>
    %90 = arith.mulf %87, %67 : vector<8x32xf32>
    %91 = arith.mulf %86, %88 : vector<8x32xf32>
    %92 = arith.addf %90, %91 : vector<8x32xf32>
    %93 = math.tanh %92 : vector<8x32xf32>
    %94 = arith.mulf %89, %93 : vector<8x32xf32>
    %95 = arith.index_cast %73 : i32 to index
    %c0_31 = arith.constant 0 : index
    %96 = vector.load %arg10[%95, %c0_31] : memref<64x32xf32, #tpu.memory_space<vmem>>, vector<8x32xf32>
    tpu.vector_store %arg10[%95, %c0_31], %94 {strides = array<i32>} : memref<64x32xf32, #tpu.memory_space<vmem>>, vector<8x32xf32>,
    %c3_i32 = arith.constant 3 : i32
    %c8_i32_32 = arith.constant 8 : i32
    %97 = arith.muli %c3_i32, %c8_i32_32 : i32
    %98 = tpu.assume_multiple %97, 8 : i32
    %99 = arith.index_cast %98 : i32 to index
    %c0_33 = arith.constant 0 : index
    %100 = vector.load %arg9[%99, %c0_33] : memref<64x128xf32, #tpu.memory_space<vmem>>, vector<8x128xf32>
    %c0_34 = arith.constant 0 : index
    %c0_35 = arith.constant 0 : index
    %101 = vector.load %arg4[%c0_34, %c0_35] : memref<32x128xf32, #tpu.memory_space<vmem>>, vector<32x128xf32>
    %cst_36 = arith.constant dense<0.000000e+00> : vector<8x128xf32>
    %102 = tpu.matmul %94, %101, %cst_36 {dimension_numbers = #tpu.dot_dimension_numbers<[1], [0], [0], [1], [0, 0, 1, 1], [], []>} : vector<8x32xf32>, vector<32x128xf32>, vector<8x128xf32> -> vector<8x128xf32>
    %103 = arith.addf %100, %102 : vector<8x128xf32>
    %104 = math.tanh %103 : vector<8x128xf32>
    %105 = arith.negf %103 : vector<8x128xf32>
    %106 = math.exp %105 : vector<8x128xf32>
    %cst_37 = arith.constant 1.000000e+00 : f32
    %107 = vector.broadcast %cst_37 : f32 to vector<8x128xf32>
    %108 = arith.addf %107, %106 : vector<8x128xf32>
    %109 = arith.divf %107, %108 : vector<8x128xf32>
    %110 = arith.select %19, %104, %109 : vector<8x128xi1>, vector<8x128xf32>
    %111 = vector.extract_strided_slice %110 {offsets = [0, 0], sizes = [8, 32], strides = [1, 1]} : vector<8x128xf32> to vector<8x32xf32>
    %112 = vector.extract_strided_slice %110 {offsets = [0, 32], sizes = [8, 32], strides = [1, 1]} : vector<8x128xf32> to vector<8x32xf32>
    %113 = vector.extract_strided_slice %110 {offsets = [0, 64], sizes = [8, 32], strides = [1, 1]} : vector<8x128xf32> to vector<8x32xf32>
    %114 = vector.extract_strided_slice %110 {offsets = [0, 96], sizes = [8, 32], strides = [1, 1]} : vector<8x128xf32> to vector<8x32xf32>
    %115 = arith.mulf %112, %92 : vector<8x32xf32>
    %116 = arith.mulf %111, %113 : vector<8x32xf32>
    %117 = arith.addf %115, %116 : vector<8x32xf32>
    %118 = math.tanh %117 : vector<8x32xf32>
    %119 = arith.mulf %114, %118 : vector<8x32xf32>
    %120 = arith.index_cast %98 : i32 to index
    %c0_38 = arith.constant 0 : index
    %121 = vector.load %arg10[%120, %c0_38] : memref<64x32xf32, #tpu.memory_space<vmem>>, vector<8x32xf32>
    tpu.vector_store %arg10[%120, %c0_38], %119 {strides = array<i32>} : memref<64x32xf32, #tpu.memory_space<vmem>>, vector<8x32xf32>,
    %c4_i32 = arith.constant 4 : i32
    %c8_i32_39 = arith.constant 8 : i32
    %122 = arith.muli %c4_i32, %c8_i32_39 : i32
    %123 = tpu.assume_multiple %122, 8 : i32
    %124 = arith.index_cast %123 : i32 to index
    %c0_40 = arith.constant 0 : index
    %125 = vector.load %arg9[%124, %c0_40] : memref<64x128xf32, #tpu.memory_space<vmem>>, vector<8x128xf32>
    %c0_41 = arith.constant 0 : index
    %c0_42 = arith.constant 0 : index
    %126 = vector.load %arg4[%c0_41, %c0_42] : memref<32x128xf32, #tpu.memory_space<vmem>>, vector<32x128xf32>
    %cst_43 = arith.constant dense<0.000000e+00> : vector<8x128xf32>
    %127 = tpu.matmul %119, %126, %cst_43 {dimension_numbers = #tpu.dot_dimension_numbers<[1], [0], [0], [1], [0, 0, 1, 1], [], []>} : vector<8x32xf32>, vector<32x128xf32>, vector<8x128xf32> -> vector<8x128xf32>
    %128 = arith.addf %125, %127 : vector<8x128xf32>
    %129 = math.tanh %128 : vector<8x128xf32>
    %130 = arith.negf %128 : vector<8x128xf32>
    %131 = math.exp %130 : vector<8x128xf32>
    %cst_44 = arith.constant 1.000000e+00 : f32
    %132 = vector.broadcast %cst_44 : f32 to vector<8x128xf32>
    %133 = arith.addf %132, %131 : vector<8x128xf32>
    %134 = arith.divf %132, %133 : vector<8x128xf32>
    %135 = arith.select %19, %129, %134 : vector<8x128xi1>, vector<8x128xf32>
    %136 = vector.extract_strided_slice %135 {offsets = [0, 0], sizes = [8, 32], strides = [1, 1]} : vector<8x128xf32> to vector<8x32xf32>
    %137 = vector.extract_strided_slice %135 {offsets = [0, 32], sizes = [8, 32], strides = [1, 1]} : vector<8x128xf32> to vector<8x32xf32>
    %138 = vector.extract_strided_slice %135 {offsets = [0, 64], sizes = [8, 32], strides = [1, 1]} : vector<8x128xf32> to vector<8x32xf32>
    %139 = vector.extract_strided_slice %135 {offsets = [0, 96], sizes = [8, 32], strides = [1, 1]} : vector<8x128xf32> to vector<8x32xf32>
    %140 = arith.mulf %137, %117 : vector<8x32xf32>
    %141 = arith.mulf %136, %138 : vector<8x32xf32>
    %142 = arith.addf %140, %141 : vector<8x32xf32>
    %143 = math.tanh %142 : vector<8x32xf32>
    %144 = arith.mulf %139, %143 : vector<8x32xf32>
    %145 = arith.index_cast %123 : i32 to index
    %c0_45 = arith.constant 0 : index
    %146 = vector.load %arg10[%145, %c0_45] : memref<64x32xf32, #tpu.memory_space<vmem>>, vector<8x32xf32>
    tpu.vector_store %arg10[%145, %c0_45], %144 {strides = array<i32>} : memref<64x32xf32, #tpu.memory_space<vmem>>, vector<8x32xf32>,
    %c5_i32 = arith.constant 5 : i32
    %c8_i32_46 = arith.constant 8 : i32
    %147 = arith.muli %c5_i32, %c8_i32_46 : i32
    %148 = tpu.assume_multiple %147, 8 : i32
    %149 = arith.index_cast %148 : i32 to index
    %c0_47 = arith.constant 0 : index
    %150 = vector.load %arg9[%149, %c0_47] : memref<64x128xf32, #tpu.memory_space<vmem>>, vector<8x128xf32>
    %c0_48 = arith.constant 0 : index
    %c0_49 = arith.constant 0 : index
    %151 = vector.load %arg4[%c0_48, %c0_49] : memref<32x128xf32, #tpu.memory_space<vmem>>, vector<32x128xf32>
    %cst_50 = arith.constant dense<0.000000e+00> : vector<8x128xf32>
    %152 = tpu.matmul %144, %151, %cst_50 {dimension_numbers = #tpu.dot_dimension_numbers<[1], [0], [0], [1], [0, 0, 1, 1], [], []>} : vector<8x32xf32>, vector<32x128xf32>, vector<8x128xf32> -> vector<8x128xf32>
    %153 = arith.addf %150, %152 : vector<8x128xf32>
    %154 = math.tanh %153 : vector<8x128xf32>
    %155 = arith.negf %153 : vector<8x128xf32>
    %156 = math.exp %155 : vector<8x128xf32>
    %cst_51 = arith.constant 1.000000e+00 : f32
    %157 = vector.broadcast %cst_51 : f32 to vector<8x128xf32>
    %158 = arith.addf %157, %156 : vector<8x128xf32>
    %159 = arith.divf %157, %158 : vector<8x128xf32>
    %160 = arith.select %19, %154, %159 : vector<8x128xi1>, vector<8x128xf32>
    %161 = vector.extract_strided_slice %160 {offsets = [0, 0], sizes = [8, 32], strides = [1, 1]} : vector<8x128xf32> to vector<8x32xf32>
    %162 = vector.extract_strided_slice %160 {offsets = [0, 32], sizes = [8, 32], strides = [1, 1]} : vector<8x128xf32> to vector<8x32xf32>
    %163 = vector.extract_strided_slice %160 {offsets = [0, 64], sizes = [8, 32], strides = [1, 1]} : vector<8x128xf32> to vector<8x32xf32>
    %164 = vector.extract_strided_slice %160 {offsets = [0, 96], sizes = [8, 32], strides = [1, 1]} : vector<8x128xf32> to vector<8x32xf32>
    %165 = arith.mulf %162, %142 : vector<8x32xf32>
    %166 = arith.mulf %161, %163 : vector<8x32xf32>
    %167 = arith.addf %165, %166 : vector<8x32xf32>
    %168 = math.tanh %167 : vector<8x32xf32>
    %169 = arith.mulf %164, %168 : vector<8x32xf32>
    %170 = arith.index_cast %148 : i32 to index
    %c0_52 = arith.constant 0 : index
    %171 = vector.load %arg10[%170, %c0_52] : memref<64x32xf32, #tpu.memory_space<vmem>>, vector<8x32xf32>
    tpu.vector_store %arg10[%170, %c0_52], %169 {strides = array<i32>} : memref<64x32xf32, #tpu.memory_space<vmem>>, vector<8x32xf32>,
    %c6_i32 = arith.constant 6 : i32
    %c8_i32_53 = arith.constant 8 : i32
    %172 = arith.muli %c6_i32, %c8_i32_53 : i32
    %173 = tpu.assume_multiple %172, 8 : i32
    %174 = arith.index_cast %173 : i32 to index
    %c0_54 = arith.constant 0 : index
    %175 = vector.load %arg9[%174, %c0_54] : memref<64x128xf32, #tpu.memory_space<vmem>>, vector<8x128xf32>
    %c0_55 = arith.constant 0 : index
    %c0_56 = arith.constant 0 : index
    %176 = vector.load %arg4[%c0_55, %c0_56] : memref<32x128xf32, #tpu.memory_space<vmem>>, vector<32x128xf32>
    %cst_57 = arith.constant dense<0.000000e+00> : vector<8x128xf32>
    %177 = tpu.matmul %169, %176, %cst_57 {dimension_numbers = #tpu.dot_dimension_numbers<[1], [0], [0], [1], [0, 0, 1, 1], [], []>} : vector<8x32xf32>, vector<32x128xf32>, vector<8x128xf32> -> vector<8x128xf32>
    %178 = arith.addf %175, %177 : vector<8x128xf32>
    %179 = math.tanh %178 : vector<8x128xf32>
    %180 = arith.negf %178 : vector<8x128xf32>
    %181 = math.exp %180 : vector<8x128xf32>
    %cst_58 = arith.constant 1.000000e+00 : f32
    %182 = vector.broadcast %cst_58 : f32 to vector<8x128xf32>
    %183 = arith.addf %182, %181 : vector<8x128xf32>
    %184 = arith.divf %182, %183 : vector<8x128xf32>
    %185 = arith.select %19, %179, %184 : vector<8x128xi1>, vector<8x128xf32>
    %186 = vector.extract_strided_slice %185 {offsets = [0, 0], sizes = [8, 32], strides = [1, 1]} : vector<8x128xf32> to vector<8x32xf32>
    %187 = vector.extract_strided_slice %185 {offsets = [0, 32], sizes = [8, 32], strides = [1, 1]} : vector<8x128xf32> to vector<8x32xf32>
    %188 = vector.extract_strided_slice %185 {offsets = [0, 64], sizes = [8, 32], strides = [1, 1]} : vector<8x128xf32> to vector<8x32xf32>
    %189 = vector.extract_strided_slice %185 {offsets = [0, 96], sizes = [8, 32], strides = [1, 1]} : vector<8x128xf32> to vector<8x32xf32>
    %190 = arith.mulf %187, %167 : vector<8x32xf32>
    %191 = arith.mulf %186, %188 : vector<8x32xf32>
    %192 = arith.addf %190, %191 : vector<8x32xf32>
    %193 = math.tanh %192 : vector<8x32xf32>
    %194 = arith.mulf %189, %193 : vector<8x32xf32>
    %195 = arith.index_cast %173 : i32 to index
    %c0_59 = arith.constant 0 : index
    %196 = vector.load %arg10[%195, %c0_59] : memref<64x32xf32, #tpu.memory_space<vmem>>, vector<8x32xf32>
    tpu.vector_store %arg10[%195, %c0_59], %194 {strides = array<i32>} : memref<64x32xf32, #tpu.memory_space<vmem>>, vector<8x32xf32>,
    %c7_i32 = arith.constant 7 : i32
    %c8_i32_60 = arith.constant 8 : i32
    %197 = arith.muli %c7_i32, %c8_i32_60 : i32
    %198 = tpu.assume_multiple %197, 8 : i32
    %199 = arith.index_cast %198 : i32 to index
    %c0_61 = arith.constant 0 : index
    %200 = vector.load %arg9[%199, %c0_61] : memref<64x128xf32, #tpu.memory_space<vmem>>, vector<8x128xf32>
    %c0_62 = arith.constant 0 : index
    %c0_63 = arith.constant 0 : index
    %201 = vector.load %arg4[%c0_62, %c0_63] : memref<32x128xf32, #tpu.memory_space<vmem>>, vector<32x128xf32>
    %cst_64 = arith.constant dense<0.000000e+00> : vector<8x128xf32>
    %202 = tpu.matmul %194, %201, %cst_64 {dimension_numbers = #tpu.dot_dimension_numbers<[1], [0], [0], [1], [0, 0, 1, 1], [], []>} : vector<8x32xf32>, vector<32x128xf32>, vector<8x128xf32> -> vector<8x128xf32>
    %203 = arith.addf %200, %202 : vector<8x128xf32>
    %204 = math.tanh %203 : vector<8x128xf32>
    %205 = arith.negf %203 : vector<8x128xf32>
    %206 = math.exp %205 : vector<8x128xf32>
    %cst_65 = arith.constant 1.000000e+00 : f32
    %207 = vector.broadcast %cst_65 : f32 to vector<8x128xf32>
    %208 = arith.addf %207, %206 : vector<8x128xf32>
    %209 = arith.divf %207, %208 : vector<8x128xf32>
    %210 = arith.select %19, %204, %209 : vector<8x128xi1>, vector<8x128xf32>
    %211 = vector.extract_strided_slice %210 {offsets = [0, 0], sizes = [8, 32], strides = [1, 1]} : vector<8x128xf32> to vector<8x32xf32>
    %212 = vector.extract_strided_slice %210 {offsets = [0, 32], sizes = [8, 32], strides = [1, 1]} : vector<8x128xf32> to vector<8x32xf32>
    %213 = vector.extract_strided_slice %210 {offsets = [0, 64], sizes = [8, 32], strides = [1, 1]} : vector<8x128xf32> to vector<8x32xf32>
    %214 = vector.extract_strided_slice %210 {offsets = [0, 96], sizes = [8, 32], strides = [1, 1]} : vector<8x128xf32> to vector<8x32xf32>
    %215 = arith.mulf %212, %192 : vector<8x32xf32>
    %216 = arith.mulf %211, %213 : vector<8x32xf32>
    %217 = arith.addf %215, %216 : vector<8x32xf32>
    %218 = math.tanh %217 : vector<8x32xf32>
    %219 = arith.mulf %214, %218 : vector<8x32xf32>
    %220 = arith.index_cast %198 : i32 to index
    %c0_66 = arith.constant 0 : index
    %221 = vector.load %arg10[%220, %c0_66] : memref<64x32xf32, #tpu.memory_space<vmem>>, vector<8x32xf32>
    tpu.vector_store %arg10[%220, %c0_66], %219 {strides = array<i32>} : memref<64x32xf32, #tpu.memory_space<vmem>>, vector<8x32xf32>,
    %c8_i32_67 = arith.constant 8 : i32
    %c0_68 = arith.constant 0 : index
    %c0_69 = arith.constant 0 : index
    %222 = vector.load %arg10[%c0_68, %c0_69] : memref<64x32xf32, #tpu.memory_space<vmem>>, vector<64x32xf32>
    %c0_70 = arith.constant 0 : index
    %c0_71 = arith.constant 0 : index
    %223 = vector.load %arg6[%c0_70, %c0_71] : memref<32x128xf32, #tpu.memory_space<vmem>>, vector<32x128xf32>
    %cst_72 = arith.constant dense<0.000000e+00> : vector<64x128xf32>
    %224 = tpu.matmul %222, %223, %cst_72 {dimension_numbers = #tpu.dot_dimension_numbers<[1], [0], [0], [1], [0, 0, 1, 1], [], []>} : vector<64x32xf32>, vector<32x128xf32>, vector<64x128xf32> -> vector<64x128xf32>
    %c0_73 = arith.constant 0 : index
    %c0_74 = arith.constant 0 : index
    %225 = vector.load %arg7[%c0_73, %c0_74] : memref<1x128xf32, #tpu.memory_space<vmem>>, vector<1x128xf32>
    %226 = vector.broadcast %225 : vector<1x128xf32> to vector<64x128xf32>
    %227 = arith.addf %224, %226 : vector<64x128xf32>
    %c0_75 = arith.constant 0 : index
    %c0_76 = arith.constant 0 : index
    %228 = vector.load %arg8[%c0_75, %c0_76] : memref<64x128xf32, #tpu.memory_space<vmem>>, vector<64x128xf32>
    tpu.vector_store %arg8[%c0_75, %c0_76], %227 {strides = array<i32>} : memref<64x128xf32, #tpu.memory_space<vmem>>, vector<64x128xf32>,
    return
  }
  func.func @transform_0(%arg0: i32) -> (i32, i32) {
    %c0_i32 = arith.constant 0 : i32
    %c0_i32_0 = arith.constant 0 : i32
    %c0_i32_1 = arith.constant 0 : i32
    return %c0_i32, %c0_i32_0 : i32, i32
  }
  func.func @transform_1(%arg0: i32) -> (i32, i32) {
    %c0_i32 = arith.constant 0 : i32
    %c0_i32_0 = arith.constant 0 : i32
    %c0_i32_1 = arith.constant 0 : i32
    return %c0_i32, %c0_i32_0 : i32, i32
  }
  func.func @transform_2(%arg0: i32) -> (i32, i32) {
    %c0_i32 = arith.constant 0 : i32
    %c0_i32_0 = arith.constant 0 : i32
    %c0_i32_1 = arith.constant 0 : i32
    return %c0_i32, %c0_i32_0 : i32, i32
  }
  func.func @transform_3(%arg0: i32) -> (i32, i32) {
    %c0_i32 = arith.constant 0 : i32
    %c0_i32_0 = arith.constant 0 : i32
    %c0_i32_1 = arith.constant 0 : i32
    return %c0_i32, %c0_i32_0 : i32, i32
  }
  func.func @transform_4(%arg0: i32) -> (i32, i32) {
    %c0_i32 = arith.constant 0 : i32
    %c0_i32_0 = arith.constant 0 : i32
    %c0_i32_1 = arith.constant 0 : i32
    return %c0_i32, %c0_i32_0 : i32, i32
  }
  func.func @transform_5(%arg0: i32) -> (i32, i32) {
    %c0_i32 = arith.constant 0 : i32
    %c0_i32_0 = arith.constant 0 : i32
    %c0_i32_1 = arith.constant 0 : i32
    return %c0_i32, %c0_i32_0 : i32, i32
  }
  func.func @transform_6(%arg0: i32) -> (i32, i32) {
    %c0_i32 = arith.constant 0 : i32
    %c0_i32_0 = arith.constant 0 : i32
    %c0_i32_1 = arith.constant 0 : i32
    return %c0_i32, %c0_i32_0 : i32, i32
  }
  func.func @transform_7(%arg0: i32) -> (i32, i32) {
    %c0_i32 = arith.constant 0 : i32
    %c0_i32_0 = arith.constant 0 : i32
    %c0_i32_1 = arith.constant 0 : i32
    return %c0_i32, %c0_i32_0 : i32, i32
  }
}

</mosaic_0001>

<bundles_post_ra>
// kernel: tpu_custom_call.1
= control target key start
LH: loop header
LB: loop body
LE: loop exit
PB: predicated region body
PF: predicated region fallthrough
CT: control target
= control target key end

     0   :  { %v1918_v2 = vmov 0   ;;  %s2274_s0 = inlined_call_operand.vmem [shape: s32[64,1], index: 0, kind: input, shape index: {}]   ;;  %s2275_s1 = inlined_call_operand.vmem [shape: f32[128,32], index: 1, kind: input, shape index: {}]   ;;  %s2276_s2 = inlined_call_operand.vmem [shape: f32[32,128], index: 2, kind: input, shape index: {}]   ;;  %s2277_s3 = inlined_call_operand.vmem [shape: f32[32,128], index: 3, kind: input, shape index: {}]   ;;  %s2278_s4 = inlined_call_operand.vmem [shape: f32[1,128], index: 4, kind: input, shape index: {}]   ;;  %s2279_s5 = inlined_call_operand.vmem [shape: f32[32,128], index: 5, kind: input, shape index: {}]   ;;  %s2280_s6 = inlined_call_operand.vmem [shape: f32[1,128], index: 6, kind: input, shape index: {}]   ;;  %s2281_s7 = inlined_call_operand.hbm [shape: f32[64,128], index: 7, kind: output, shape index: {}]  }
   0x1   :  { %v31_v0 = vld [vmem:[%s2274_s0 + $0x10] sm:$0xff]  ;;  %v29_v1 = vld [vmem:[%s2274_s0] sm:$0xff]  ;;  %1829 = vset.pattern.permute.xlu1 %v1918_v2  ;;  %1828 = vset.pattern.permute.xlu0 %v1918_v2  ;;  %v32_v3 = vld [vmem:[%s2274_s0 + $0x18] sm:$0xff] }
   0x2   :  { %44 = vperm.xlu1 %1829, %v31_v0   ;;  %38 = vperm.xlu0 %1828, %v29_v1   ;;  %v30_v4 = vld [vmem:[%s2274_s0 + $0x8] sm:$0xff]  ;;  %v85_v5 = vld [vmem:[%s2275_s1] sm:$0xff]  ;;  %v87_v7 = vld [vmem:[%s2275_s1 + $0x10] sm:$0xff] }
   0x3   :  { %v86_v6 = vld [vmem:[%s2275_s1 + $0x8] sm:$0xff]  ;;  %v88_v8 = vld [vmem:[%s2275_s1 + $0x18] sm:$0xff]  ;;  %v89_v11 = vld [vmem:[%s2275_s1 + $0x20] sm:$0xff] }
   0x4   :  { %v1718_v9 = vpack.c.bf16 %v86_v6, %v85_v5  ;;  %v1722_v10 = vpack.c.bf16 %v88_v8, %v87_v7  ;;  %v90_v12 = vld [vmem:[%s2275_s1 + $0x28] sm:$0xff]  ;;  %v33_v14 = vld [vmem:[%s2274_s0 + $0x20] sm:$0xff] }
   0x5   :  { %v34_v13 = vld [vmem:[%s2274_s0 + $0x28] sm:$0xff] }
   0x6   :  { %47 = vperm.xlu1 %1829, %v32_v3   ;;  %41 = vperm.xlu0 %1828, %v30_v4  }
   0x7   :  { %1719 = vmatprep.subr.bf16.mxu0 %v1718_v9 }
   0x8   :  { %1721 = vmatpush3.bf16.msra.mxu0 %v1718_v9 }
   0x9   :  { %12 = vsyncpa [#allocation5], 0  ;;  %1723 = vmatprep.subr.bf16.mxu0 %v1722_v10  ;;  %v1726_v15 = vpack.c.bf16 %v90_v12, %v89_v11  ;;  %v91_v16 = vld [vmem:[%s2275_s1 + $0x30] sm:$0xff]  ;;  %v92_v17 = vld [vmem:[%s2275_s1 + $0x38] sm:$0xff]  ;;  %v27_v39 = vlaneseq  ;;  %v1919_v43 = vmov 1.0   ;;  %v1920_v50 = vmov 0.0|0.0  }
   0xa   :  { %53 = vperm.xlu1 %1829, %v34_v13   ;;  %50 = vperm.xlu0 %1828, %v33_v14   ;;  %v36_v18 = vld [vmem:[%s2274_s0 + $0x38] sm:$0xff]  ;;  %v35_v19 = vld [vmem:[%s2274_s0 + $0x30] sm:$0xff]  ;;  %v1730_v20 = vpack.c.bf16 %v92_v17, %v91_v16  ;;  %v93_v21 = vld [vmem:[%s2275_s1 + $0x40] sm:$0xff]  ;;  %vm217_vm8 = vcmask 261120   ;;  %vm1921_vm9 = vmmov 0   ;;  %v1922_v62 = vmov 0.0  }
   0xb   :  { %v94_v22 = vld [vmem:[%s2275_s1 + $0x48] sm:$0xff]  ;;  %v95_v24 = vld [vmem:[%s2275_s1 + $0x50] sm:$0xff]  ;;  %v96_v25 = vld [vmem:[%s2275_s1 + $0x58] sm:$0xff]  ;;  %v2052_v40 = vand.u32 127, %v27_v39  ;;  %s1924_s16 = smov 32  }
   0xc   :  { %1725 = vmatpush3.bf16.msra.mxu0 %v1722_v10  ;;  %v1734_v23 = vpack.c.bf16 %v94_v22, %v93_v21  ;;  %v206_v26 = vld [vmem:[%s2276_s2] sm:$0xff]  ;;  %v207_v27 = vld [vmem:[%s2276_s2 + $0x8] sm:$0xff]  ;;  %v208_v28 = vld [vmem:[%s2276_s2 + $0x10] sm:$0xff]  ;;  %v1738_v31 = vpack.c.bf16 %v96_v25, %v95_v24 }
   0xd   :  { %1727 = vmatprep.subr.bf16.mxu0 %v1726_v15  ;;  %v1750_v29 = vpack.c.bf16 %v207_v27, %v206_v26  ;;  %v209_v30 = vld [vmem:[%s2276_s2 + $0x18] sm:$0xff]  ;;  %v97_v32 = vld [vmem:[%s2275_s1 + $0x60] sm:$0xff]  ;;  %v98_v33 = vld [vmem:[%s2275_s1 + $0x68] sm:$0xff]  ;;  %vm355_vm10 = vcmp.ge.s32.totalorder %v2052_v40, 64  ;;  %vm356_vm11 = vcmp.lt.s32.totalorder %v2052_v40, 96 }
   0xe   :  { %59 = vperm.xlu1 %1829, %v36_v18   ;;  %56 = vperm.xlu0 %1828, %v35_v19   ;;  %v1754_v34 = vpack.c.bf16 %v209_v30, %v208_v28  ;;  %v1742_v35 = vpack.c.bf16 %v98_v33, %v97_v32  ;;  %v99_v36 = vld [vmem:[%s2275_s1 + $0x70] sm:$0xff]  ;;  %v100_v37 = vld [vmem:[%s2275_s1 + $0x78] sm:$0xff]  ;;  %v359_v51 = vld [vmem:[%s2277_s3] sm:$0xff] }
   0xf   :  { %1814 = vmatprep.subr.bf16.mxu1 %v1750_v29  ;;  %v1746_v38 = vpack.c.bf16 %v100_v37, %v99_v36  ;;  %v360_v52 = vld [vmem:[%s2277_s3 + $0x8] sm:$0xff]  ;;  %v361_v56 = vld [vmem:[%s2277_s3 + $0x10] sm:$0xff]  ;;  %v362_v57 = vld [vmem:[%s2277_s3 + $0x18] sm:$0xff] }
  0x10   :  { %1729 = vmatpush3.bf16.msra.mxu0 %v1726_v15  ;;  %1816 = vmatpush3.bf16.msra.mxu1 %v1750_v29  ;;  %v2071_v55 = vpack.c.bf16 %v360_v52, %v359_v51  ;;  %v2083_v60 = vpack.c.bf16 %v362_v57, %v361_v56  ;;  %v1425_v2 = vld [vmem:[%s2278_s4] ss:$0 sm:$0xff]  ;;  %vm2124_vm12 = vmand %vm355_vm10, %vm356_vm11  ;;  %s1923_s4 = smov 64  }
  0x11   :  { %1731 = vmatprep.subr.bf16.mxu0 %v1730_v20  ;;  %1815 = vmatprep.subr.bf16.mxu1 %v1754_v34 }
  0x14   :  { %1733 = vmatpush3.bf16.msra.mxu0 %v1730_v20  ;;  %1817 = vmatpush3.bf16.msra.mxu1 %v1754_v34 }
  0x15   :  { %1735 = vmatprep.subr.bf16.mxu0 %v1734_v23  ;;  %1758 = vmatprep.subr.bf16.mxu1 %v1920_v50 }
  0x18   :  { %1737 = vmatpush3.bf16.msra.mxu0 %v1734_v23 }
  0x19   :  { %1739 = vmatprep.subr.bf16.mxu0 %v1738_v31 }
  0x1c   :  { %1741 = vmatpush3.bf16.msra.mxu0 %v1738_v31 }
  0x1d   :  { %1743 = vmatprep.subr.bf16.mxu0 %v1742_v35 }
  0x20   :  { %1745 = vmatpush3.bf16.msra.mxu0 %v1742_v35 }
  0x21   :  { %1747 = vmatprep.subr.bf16.mxu0 %v1746_v38 }
  0x24   :  { %1749 = vmatpush3.bf16.msra.mxu0 %v1746_v38 }
  0x25   :  { %1751 = vmatprep.subr.bf16.mxu0 %v1750_v29 }
  0x81   :  { %v45_v41 = vpop.permute.xlu1 %44  ;;  %v39_v42 = vpop.permute.xlu0 %38 }
  0x82   :  { %vm61_vm0 = vcmp.eq.s32.totalorder %v39_v42, %v2052_v40  ;;  %vm63_vm1 = vcmp.eq.s32.totalorder %v45_v41, %v2052_v40 }
  0x83   :  { %1578 = vmatprep.mubr.msk.f32.mxu0 %vm61_vm0, %v1919_v43 }
  0x85   :  { %v48_v44 = vpop.permute.xlu1 %47  ;;  %v42_v45 = vpop.permute.xlu0 %41 }
  0x86   :  { %vm62_vm2 = vcmp.eq.s32.totalorder %v42_v45, %v2052_v40  ;;  %vm64_vm3 = vcmp.eq.s32.totalorder %v48_v44, %v2052_v40 }
  0x87   :  { %1579 = vmatmul.mubr.msk.f32.vlgmr.msra.gmra.mrb[0].mxu0 %vm62_vm2, %v1919_v43 }
  0x88   :  { %1581 = vmatprep.mubr.msk.f32.mxu0 %vm63_vm1, %v1919_v43  ;;  %1753 = vmatpush3.bf16.msra.mxu0 %v1750_v29 }
  0x89   :  { %v54_v46 = vpop.permute.xlu1 %53  ;;  %v51_v47 = vpop.permute.xlu0 %50  ;;  %1755 = vmatprep.subr.bf16.mxu0 %v1754_v34 }
  0x8a   :  { %vm65_vm4 = vcmp.eq.s32.totalorder %v51_v47, %v2052_v40  ;;  %vm66_vm5 = vcmp.eq.s32.totalorder %v54_v46, %v2052_v40 }
  0x8b   :  { %1582 = vmatmul.mubr.msk.f32.gmra.mrb[2].mxu0 %vm64_vm3, %v1919_v43 }
  0x8c   :  { %1584 = vmatprep.mubr.msk.f32.mxu0 %vm65_vm4, %v1919_v43  ;;  %1757 = vmatpush3.bf16.msra.mxu0 %v1754_v34 }
  0x8d   :  { %v57_v48 = vpop.permute.xlu0 %56  ;;  %v60_v49 = vpop.permute.xlu1 %59  ;;  %1776 = vmatprep.subr.bf16.mxu0 %v1920_v50 }
  0x8e   :  { %vm67_vm6 = vcmp.eq.s32.totalorder %v57_v48, %v2052_v40  ;;  %vm68_vm7 = vcmp.eq.s32.totalorder %v60_v49, %v2052_v40 }
  0x8f   :  { %1585 = vmatmul.mubr.msk.f32.gmra.mrb[4].mxu0 %vm66_vm5, %v1919_v43 }
  0x90   :  { %1587 = vmatprep.mubr.msk.f32.mxu0 %vm67_vm6, %v1919_v43 }
  0x93   :  { %1588 = vmatmul.mubr.msk.f32.gmra.mrb[6].mxu0 %vm68_vm7, %v1919_v43 }
 0x15a   :  { %v1580_v53 = vpop.f32.mrb[0].mxu0 }
 0x15b   :  { %v167_v54 = vpop.f32.mrb[1].mxu0 }
 0x15c   :  { %1598 = vmatprep.mubr.msk.f32.mxu0 %vm217_vm8, %v167_v54 }
 0x15d   :  { %1599 = vmatmul.mubr.msk.f32.vlgmr.msra.gmra.mrb[8].mxu0 %vm217_vm8, %v1580_v53 }
 0x15e   :  { %v1583_v58 = vpop.f32.mrb[2].mxu0  ;;  %1778 = vmatpush3.bf16.msra.mxu0 %v2071_v55 }
 0x15f   :  { %v177_v59 = vpop.f32.mrb[3].mxu0  ;;  %1779 = vmatprep.subr.bf16.mxu0 %v1920_v50 }
 0x160   :  { %1601 = vmatprep.mubr.msk.f32.mxu0 %vm217_vm8, %v177_v59 }
 0x161   :  { %1602 = vmatmul.mubr.msk.f32.gmra.mrb[10].mxu0 %vm217_vm8, %v1583_v58 }
 0x162   :  { %v1586_v61 = vpop.f32.mrb[4].mxu0  ;;  %1781 = vmatpush3.bf16.msra.mxu0 %v2083_v60  ;;  %1651 = vmatprep.mubr.msk.f32.mxu0 %vm1921_vm9, %v1922_v62 }
 0x163   :  { %v187_v63 = vpop.f32.mrb[5].mxu0  ;;  %1788 = vmatprep.subr.bf16.mxu0 %v1920_v50 }
 0x164   :  { %1604 = vmatprep.mubr.msk.f32.mxu1 %vm217_vm8, %v187_v63 }
 0x165   :  { %1605 = vmatmul.mubr.msk.f32.vlgmr.msra.gmra.mrb[0].mxu1 %vm217_vm8, %v1586_v61 }
 0x166   :  { %1760 = vmatpush3.bf16.msra.mxu1 %v2071_v55  ;;  %v1589_v0 = vpop.f32.mrb[6].mxu0 }
 0x167   :  { %v197_v1 = vpop.f32.mrb[7].mxu0  ;;  %1761 = vmatprep.subr.bf16.mxu1 %v1920_v50 }
 0x168   :  { %1607 = vmatprep.mubr.msk.f32.mxu1 %vm217_vm8, %v197_v1 }
 0x169   :  { %1608 = vmatmul.mubr.msk.f32.gmra.mrb[2].mxu1 %vm217_vm8, %v1589_v0 }
 0x16a   :  { %1763 = vmatpush3.bf16.msra.mxu1 %v2083_v60  ;;  %1618 = vmatprep.mubr.msk.f32.mxu1 %vm1921_vm9, %v1922_v62 }
 0x16b   :  { %1764 = vmatprep.subr.bf16.mxu1 %v1920_v50 }
 0x16d   :  { %1619 = vmatmul.mubr.f32.vlgmr.msra.gmra.mrb[4].mxu1 %v1922_v62 }
 0x16e   :  { %1766 = vmatpush3.bf16.msra.mxu1 %v2071_v55  ;;  %1629 = vmatprep.mubr.msk.f32.mxu1 %vm1921_vm9, %v1922_v62 }
 0x16f   :  { %1767 = vmatprep.subr.bf16.mxu1 %v1920_v50 }
 0x172   :  { %1769 = vmatpush3.bf16.msra.mxu1 %v2083_v60 }
 0x173   :  { %1770 = vmatprep.subr.bf16.mxu1 %v1920_v50 }
 0x230   :  { %v1600_v3 = vpop.f32.mrb[8].mxu0 }
 0x231   :  { %v314_v4 = vadd.f32 %v1600_v3, %v1425_v2  ;;  %v308_v5 = vpop.f32.mrb[9].mxu0 }
 0x232   :  { %v309_v18 = vadd.f32 %v1425_v2, %v308_v5 }
 0x234   :  { %v1603_v6 = vpop.f32.mrb[10].mxu0 }
 0x235   :  { %v2110_v7 = vadd.f32 %v1603_v6, %v1425_v2  ;;  %v318_v8 = vpop.f32.mrb[11].mxu0 }
 0x236   :  { %v2112_v9 = vadd.f32 %v1425_v2, %v318_v8 }
 0x238   :  { %v1606_v10 = vpop.f32.mrb[0].mxu1 }
 0x239   :  { %v2114_v11 = vadd.f32 %v1606_v10, %v1425_v2  ;;  %v328_v12 = vpop.f32.mrb[1].mxu1 }
 0x23a   :  { %v2116_v13 = vadd.f32 %v1425_v2, %v328_v12 }
 0x23c   :  { %v1609_v14 = vpop.f32.mrb[2].mxu1 }
 0x23d   :  { %v2118_v15 = vadd.f32 %v1609_v14, %v1425_v2  ;;  %v338_v16 = vpop.f32.mrb[3].mxu1 }
 0x23e   :  { %v2120_v17 = vadd.f32 %v1425_v2, %v338_v16 }
 0x240   :  { %v432_v19 = vpop.f32.mrb[4].mxu1 }
 0x241   :  { %v436_v20 = vadd.f32 %v432_v19, %v309_v18  ;;  %v1620_v21 = vpop.f32.mrb[5].mxu1 }
 0x243   :  { %v1434_v22 = vmul.f32 -1.442695, %v436_v20 }
 0x245   :  { %1830 = vpow2.f32 %v1434_v22 }
 0x246   :  { %1832 = vtanh.f32 %v436_v20 }
 0x24f   :  { %v1831_v23 = vpop.eup %1830 }
 0x250   :  { %v441_v24 = vadd.f32 1.0, %v1831_v23  ;;  %v1833_v26 = vpop.eup %1832 }
 0x252   :  { %1834 = vrcp.f32 %v441_v24 }
 0x25c   :  { %v1835_v27 = vpop.eup %1834 }
 0x25d   :  { %v444_v28 = vsel %vm2124_vm12, %v1833_v26, %v1835_v27 }
 0x25e   :  { %447 = vrot.lane.b32.xlu0 %v444_v28, %s1923_s4  ;;  %v445_v31 = vmul.f32 0.0, %v444_v28 }
 0x2d0   :  { %v448_v29 = vpop.permute.xlu0 %447 }
 0x2d1   :  { %v450_v30 = vmul.f32 %v448_v29, %v444_v28 }
 0x2d3   :  { %452 = vrot.lane.b32.xlu1 %v450_v30, %s1924_s16 }
 0x345   :  { %v453_v32 = vpop.permute.xlu1 %452 }
 0x346   :  { %v455_v33 = vadd.f32 %v453_v32, %v445_v31 }
 0x348   :  { %1836 = vtanh.f32 %v455_v33 }
 0x352   :  { %v1837_v34 = vpop.eup %1836 }
 0x353   :  { %458 = vrot.lane.b32.xlu0 %v1837_v34, %s1923_s4 }
 0x3c5   :  { %v459_v35 = vpop.permute.xlu0 %458 }
 0x3c6   :  { %v461_v36 = vmul.f32 %v459_v35, %v444_v28 }
 0x3c8   :  { %463 = vrot.lane.b32.xlu1 %v461_v36, %s1924_s16 }
 0x43a   :  { %v464_v37 = vpop.permute.xlu1 %463 }
 0x43b   :  { %466 = vst.msk [vmem:[#allocation3] sm:$0xff] %vm217_vm8, %v464_v37  ;;  %1630 = vmatmul.mubr.msk.f32.vlgmr.msra.gmra.mrb[6].mxu1 %vm217_vm8, %v464_v37 }
 0x43c   :  { %1772 = vmatpush3.bf16.msra.mxu1 %v2071_v55  ;;  %1640 = vmatprep.mubr.msk.f32.mxu1 %vm1921_vm9, %v1922_v62 }
 0x43d   :  { %1773 = vmatprep.subr.bf16.mxu1 %v1920_v50 }
 0x440   :  { %1775 = vmatpush3.bf16.msra.mxu1 %v2083_v60 }
 0x441   :  { %1782 = vmatprep.subr.bf16.mxu1 %v1920_v50 }
 0x50e   :  { %v541_v38 = vpop.f32.mrb[6].mxu1 }
 0x50f   :  { %v545_v39 = vadd.f32 %v541_v38, %v314_v4  ;;  %v1631_v40 = vpop.f32.mrb[7].mxu1 }
 0x511   :  { %v1436_v41 = vmul.f32 -1.442695, %v545_v39 }
 0x513   :  { %1838 = vpow2.f32 %v1436_v41 }
 0x514   :  { %1840 = vtanh.f32 %v545_v39 }
 0x51d   :  { %v1839_v42 = vpop.eup %1838 }
 0x51e   :  { %v550_v43 = vadd.f32 1.0, %v1839_v42  ;;  %v1841_v44 = vpop.eup %1840 }
 0x520   :  { %1842 = vrcp.f32 %v550_v43 }
 0x52a   :  { %v1843_v45 = vpop.eup %1842 }
 0x52b   :  { %v553_v46 = vsel %vm2124_vm12, %v1841_v44, %v1843_v45 }
 0x52c   :  { %556 = vrot.lane.b32.xlu0 %v553_v46, %s1923_s4  ;;  %v554_v49 = vmul.f32 %v553_v46, %v455_v33 }
 0x59e   :  { %v557_v47 = vpop.permute.xlu0 %556 }
 0x59f   :  { %v559_v48 = vmul.f32 %v557_v47, %v553_v46 }
 0x5a1   :  { %561 = vrot.lane.b32.xlu1 %v559_v48, %s1924_s16 }
 0x613   :  { %v562_v51 = vpop.permute.xlu1 %561 }
 0x614   :  { %v564_v52 = vadd.f32 %v562_v51, %v554_v49 }
 0x616   :  { %1844 = vtanh.f32 %v564_v52 }
 0x620   :  { %v1845_v53 = vpop.eup %1844 }
 0x621   :  { %567 = vrot.lane.b32.xlu0 %v1845_v53, %s1923_s4 }
 0x693   :  { %v568_v54 = vpop.permute.xlu0 %567 }
 0x694   :  { %v570_v56 = vmul.f32 %v568_v54, %v553_v46 }
 0x696   :  { %572 = vrot.lane.b32.xlu1 %v570_v56, %s1924_s16 }
 0x708   :  { %v573_v57 = vpop.permute.xlu1 %572 }
 0x709   :  { %576 = vst.msk [vmem:[#allocation3 + $0x8] sm:$0xff] %vm217_vm8, %v573_v57  ;;  %1641 = vmatmul.mubr.msk.f32.vlgmr.msra.gmra.mrb[8].mxu1 %vm217_vm8, %v573_v57 }
 0x70a   :  { %1784 = vmatpush3.bf16.msra.mxu1 %v2071_v55  ;;  %1662 = vmatprep.mubr.msk.f32.mxu1 %vm1921_vm9, %v1922_v62 }
 0x70b   :  { %1785 = vmatprep.subr.bf16.mxu1 %v1920_v50 }
 0x70e   :  { %1787 = vmatpush3.bf16.msra.mxu1 %v2083_v60 }
 0x70f   :  { %1794 = vmatprep.subr.bf16.mxu1 %v1920_v50 }
 0x7dc   :  { %v651_v58 = vpop.f32.mrb[8].mxu1 }
 0x7dd   :  { %v655_v59 = vadd.f32 %v651_v58, %v2112_v9  ;;  %v1642_v61 = vpop.f32.mrb[9].mxu1 }
 0x7df   :  { %v1438_v63 = vmul.f32 -1.442695, %v655_v59 }
 0x7e1   :  { %1846 = vpow2.f32 %v1438_v63 }
 0x7e2   :  { %1848 = vtanh.f32 %v655_v59 }
 0x7eb   :  { %v1847_v0 = vpop.eup %1846 }
 0x7ec   :  { %v660_v1 = vadd.f32 1.0, %v1847_v0  ;;  %v1849_v2 = vpop.eup %1848 }
 0x7ee   :  { %1850 = vrcp.f32 %v660_v1 }
 0x7f8   :  { %v1851_v3 = vpop.eup %1850 }
 0x7f9   :  { %v663_v4 = vsel %vm2124_vm12, %v1849_v2, %v1851_v3  ;;  %v1245_v3 = vld [vmem:[%s2279_s5] sm:$0xff] }
 0x7fa   :  { %666 = vrot.lane.b32.xlu0 %v663_v4, %s1923_s4  ;;  %v664_v8 = vmul.f32 %v663_v4, %v564_v52 }
 0x86c   :  { %v667_v5 = vpop.permute.xlu0 %666 }
 0x86d   :  { %v669_v6 = vmul.f32 %v667_v5, %v663_v4 }
 0x86f   :  { %671 = vrot.lane.b32.xlu1 %v669_v6, %s1924_s16 }
 0x8e1   :  { %v672_v9 = vpop.permute.xlu1 %671 }
 0x8e2   :  { %v674_v10 = vadd.f32 %v672_v9, %v664_v8 }
 0x8e4   :  { %1852 = vtanh.f32 %v674_v10 }
 0x8ee   :  { %v1853_v12 = vpop.eup %1852 }
 0x8ef   :  { %677 = vrot.lane.b32.xlu0 %v1853_v12, %s1923_s4  ;;  %v1248_v12 = vld [vmem:[%s2279_s5 + $0x18] sm:$0xff] }
 0x961   :  { %v678_v14 = vpop.permute.xlu0 %677 }
 0x962   :  { %v680_v16 = vmul.f32 %v678_v14, %v663_v4  ;;  %v1246_v4 = vld [vmem:[%s2279_s5 + $0x8] sm:$0xff] }
 0x963   :  { %v1806_v5 = vpack.c.bf16 %v1246_v4, %v1245_v3 }
 0x964   :  { %682 = vrot.lane.b32.xlu1 %v680_v16, %s1924_s16 }
 0x9d6   :  { %v683_v18 = vpop.permute.xlu1 %682 }
 0x9d7   :  { %686 = vst.msk [vmem:[#allocation3 + $0x10] sm:$0xff] %vm217_vm8, %v683_v18  ;;  %1652 = vmatmul.mubr.msk.f32.vlgmr.msra.gmra.mrb[12].mxu0 %vm217_vm8, %v683_v18  ;;  %v1237_v18 = vld [vmem:[#allocation3] sm:$0xff] }
 0x9d8   :  { %1790 = vmatpush3.bf16.msra.mxu0 %v2071_v55  ;;  %1673 = vmatprep.mubr.msk.f32.mxu0 %vm1921_vm9, %v1922_v62 }
 0x9d9   :  { %1791 = vmatprep.subr.bf16.mxu0 %v1920_v50 }
 0x9dc   :  { %1793 = vmatpush3.bf16.msra.mxu0 %v2083_v60 }
 0x9dd   :  { %1800 = vmatprep.subr.bf16.mxu0 %v1920_v50 }
 0xaaa   :  { %v761_v19 = vpop.f32.mrb[12].mxu0 }
 0xaab   :  { %v765_v20 = vadd.f32 %v761_v19, %v2110_v7  ;;  %v1653_v21 = vpop.f32.mrb[13].mxu0  ;;  %v1238_v19 = vld [vmem:[#allocation3 + $0x8] sm:$0xff] }
 0xaad   :  { %v1440_v22 = vmul.f32 -1.442695, %v765_v20 }
 0xaaf   :  { %1854 = vpow2.f32 %v1440_v22 }
 0xab0   :  { %1856 = vtanh.f32 %v765_v20  ;;  %v1239_v20 = vld [vmem:[#allocation3 + $0x10] sm:$0xff] }
 0xab9   :  { %v1855_v23 = vpop.eup %1854 }
 0xaba   :  { %v770_v24 = vadd.f32 1.0, %v1855_v23  ;;  %v1857_v26 = vpop.eup %1856 }
 0xabc   :  { %1858 = vrcp.f32 %v770_v24 }
 0xac6   :  { %v1859_v27 = vpop.eup %1858 }
 0xac7   :  { %v773_v28 = vsel %vm2124_vm12, %v1857_v26, %v1859_v27 }
 0xac8   :  { %776 = vrot.lane.b32.xlu0 %v773_v28, %s1923_s4  ;;  %v774_v31 = vmul.f32 %v773_v28, %v674_v10  ;;  %v1247_v10 = vld [vmem:[%s2279_s5 + $0x10] sm:$0xff] }
 0xac9   :  { %v1810_v14 = vpack.c.bf16 %v1248_v12, %v1247_v10 }
 0xb3a   :  { %v777_v29 = vpop.permute.xlu0 %776 }
 0xb3b   :  { %v779_v30 = vmul.f32 %v777_v29, %v773_v28  ;;  %v2233_v29 = vld [vmem:[%s2280_s6] ss:$0 sm:$0xff]  ;;  %s1925_s6 = smov [#allocation4]  }
 0xb3c   :  { %s1398_s26 = sshll.u32 %s1925_s6, 4  ;;  %s1399_s26 = int_to_ptr.vmem [resolvable:$true] %s1398_s26 }
 0xb3d   :  { %781 = vrot.lane.b32.xlu1 %v779_v30, %s1924_s16  ;;  %s1894_s27 = scalar_lea.vmem %s1399_s26, 1024  ;;  %p1899_p1 = scmp.lt.s32.totalorder %s1399_s26, %s1399_s26 }
 0xb3e   :  { %p1895_p0 = scmp.ne.s32.totalorder %s1399_s26, %s1894_s27  ;;  %p1900_p2 = scmp.lt.s32.totalorder %s1894_s27, %s1894_s27 }
 0xb40   :  { %p1901_p3 = por %p1900_p2, %p1899_p1 }
 0xb42   :  { %p1902_p4 = pnand %p1901_p3, %p1895_p0 }
 0xbaf   :  { %v782_v7 = vpop.permute.xlu1 %781 }
 0xbb0   :  { %v784_v32 = vadd.f32 %v782_v7, %v774_v31 }
 0xbb2   :  { %1860 = vtanh.f32 %v784_v32 }
 0xbbc   :  { %v1861_v33 = vpop.eup %1860 }
 0xbbd   :  { %787 = vrot.lane.b32.xlu0 %v1861_v33, %s1923_s4 }
 0xc2f   :  { %v788_v34 = vpop.permute.xlu0 %787 }
 0xc30   :  { %v790_v35 = vmul.f32 %v788_v34, %v773_v28 }
 0xc32   :  { %792 = vrot.lane.b32.xlu1 %v790_v35, %s1924_s16 }
 0xca4   :  { %v793_v36 = vpop.permute.xlu1 %792 }
 0xca5   :  { %796 = vst.msk [vmem:[#allocation3 + $0x18] sm:$0xff] %vm217_vm8, %v793_v36  ;;  %1663 = vmatmul.mubr.msk.f32.vlgmr.msra.gmra.mrb[10].mxu1 %vm217_vm8, %v793_v36 }
 0xca6   :  { %1796 = vmatpush3.bf16.msra.mxu1 %v2071_v55  ;;  %1684 = vmatprep.mubr.msk.f32.mxu1 %vm1921_vm9, %v1922_v62 }
 0xca7   :  { %1797 = vmatprep.subr.bf16.mxu1 %v1920_v50 }
 0xcaa   :  { %1799 = vmatpush3.bf16.msra.mxu1 %v2083_v60 }
 0xcab   :  { %1807 = vmatprep.subr.bf16.mxu1 %v1806_v5 }
 0xcac   :  { %v1240_v21 = vld [vmem:[#allocation3 + $0x18] sm:$0xff] }
 0xd78   :  { %v871_v37 = vpop.f32.mrb[10].mxu1 }
 0xd79   :  { %v875_v38 = vadd.f32 %v871_v37, %v2116_v13  ;;  %v1664_v39 = vpop.f32.mrb[11].mxu1 }
 0xd7b   :  { %v1442_v40 = vmul.f32 -1.442695, %v875_v38 }
 0xd7d   :  { %1862 = vpow2.f32 %v1442_v40 }
 0xd7e   :  { %1864 = vtanh.f32 %v875_v38 }
 0xd87   :  { %v1863_v41 = vpop.eup %1862 }
 0xd88   :  { %v880_v42 = vadd.f32 1.0, %v1863_v41  ;;  %v1865_v43 = vpop.eup %1864 }
 0xd8a   :  { %1866 = vrcp.f32 %v880_v42 }
 0xd94   :  { %v1867_v44 = vpop.eup %1866 }
 0xd95   :  { %v883_v45 = vsel %vm2124_vm12, %v1865_v43, %v1867_v44 }
 0xd96   :  { %886 = vrot.lane.b32.xlu0 %v883_v45, %s1923_s4  ;;  %v884_v48 = vmul.f32 %v883_v45, %v784_v32 }
 0xe08   :  { %v887_v46 = vpop.permute.xlu0 %886 }
 0xe09   :  { %v889_v47 = vmul.f32 %v887_v46, %v883_v45 }
 0xe0b   :  { %891 = vrot.lane.b32.xlu1 %v889_v47, %s1924_s16 }
 0xe7d   :  { %v892_v13 = vpop.permute.xlu1 %891 }
 0xe7e   :  { %v894_v49 = vadd.f32 %v892_v13, %v884_v48 }
 0xe80   :  { %1868 = vtanh.f32 %v894_v49 }
 0xe8a   :  { %v1869_v51 = vpop.eup %1868 }
 0xe8b   :  { %897 = vrot.lane.b32.xlu0 %v1869_v51, %s1923_s4 }
 0xefd   :  { %v898_v52 = vpop.permute.xlu0 %897 }
 0xefe   :  { %v900_v53 = vmul.f32 %v898_v52, %v883_v45 }
 0xf00   :  { %902 = vrot.lane.b32.xlu1 %v900_v53, %s1924_s16 }
 0xf72   :  { %v903_v54 = vpop.permute.xlu1 %902 }
 0xf73   :  { %906 = vst.msk [vmem:[#allocation3 + $0x20] sm:$0xff] %vm217_vm8, %v903_v54  ;;  %1674 = vmatmul.mubr.msk.f32.vlgmr.msra.gmra.mrb[14].mxu0 %vm217_vm8, %v903_v54 }
 0xf74   :  { %1802 = vmatpush3.bf16.msra.mxu0 %v2071_v55  ;;  %1695 = vmatprep.mubr.msk.f32.mxu0 %vm1921_vm9, %v1922_v62 }
 0xf75   :  { %1803 = vmatprep.subr.bf16.mxu0 %v1920_v50 }
 0xf78   :  { %1805 = vmatpush3.bf16.msra.mxu0 %v2083_v60 }
 0xf7a   :  { %v1241_v22 = vld [vmem:[#allocation3 + $0x20] sm:$0xff] }
0x1046   :  { %v981_v56 = vpop.f32.mrb[14].mxu0 }
0x1047   :  { %v985_v57 = vadd.f32 %v981_v56, %v2114_v11  ;;  %v1675_v58 = vpop.f32.mrb[15].mxu0 }
0x1049   :  { %v1444_v59 = vmul.f32 -1.442695, %v985_v57 }
0x104b   :  { %1870 = vpow2.f32 %v1444_v59 }
0x104c   :  { %1872 = vtanh.f32 %v985_v57 }
0x1055   :  { %v1871_v61 = vpop.eup %1870 }
0x1056   :  { %v990_v63 = vadd.f32 1.0, %v1871_v61  ;;  %v1873_v0 = vpop.eup %1872 }
0x1058   :  { %1874 = vrcp.f32 %v990_v63 }
0x1062   :  { %v1875_v1 = vpop.eup %1874 }
0x1063   :  { %v993_v55 = vsel %vm2124_vm12, %v1873_v0, %v1875_v1 }
0x1064   :  { %996 = vrot.lane.b32.xlu0 %v993_v55, %s1923_s4  ;;  %v994_v60 = vmul.f32 %v993_v55, %v894_v49 }
0x10d6   :  { %v997_v50 = vpop.permute.xlu0 %996 }
0x10d7   :  { %v999_v62 = vmul.f32 %v997_v50, %v993_v55 }
0x10d9   :  { %1001 = vrot.lane.b32.xlu1 %v999_v62, %s1924_s16 }
0x114b   :  { %v1002_v11 = vpop.permute.xlu1 %1001 }
0x114c   :  { %v2204_v2 = vadd.f32 %v1002_v11, %v994_v60 }
0x114e   :  { %1876 = vtanh.f32 %v2204_v2 }
0x1158   :  { %v1877_v6 = vpop.eup %1876 }
0x1159   :  { %1007 = vrot.lane.b32.xlu0 %v1877_v6, %s1923_s4 }
0x11cb   :  { %v1008_v8 = vpop.permute.xlu0 %1007 }
0x11cc   :  { %v1010_v9 = vmul.f32 %v1008_v8, %v993_v55 }
0x11ce   :  { %1012 = vrot.lane.b32.xlu1 %v1010_v9, %s1924_s16 }
0x1240   :  { %v1013_v16 = vpop.permute.xlu1 %1012 }
0x1241   :  { %1016 = vst.msk [vmem:[#allocation3 + $0x28] sm:$0xff] %vm217_vm8, %v1013_v16  ;;  %1685 = vmatmul.mubr.msk.f32.vlgmr.msra.gmra.mrb[12].mxu1 %vm217_vm8, %v1013_v16 }
0x1242   :  { %1809 = vmatpush3.bf16.msra.mxu1 %v1806_v5  ;;  %1706 = vmatprep.mubr.msk.f32.mxu1 %vm217_vm8, %v1237_v18 }
0x1243   :  { %1811 = vmatprep.subr.bf16.mxu1 %v1810_v14 }
0x1246   :  { %1813 = vmatpush3.bf16.msra.mxu1 %v1810_v14 }
0x1248   :  { %v1242_v23 = vld [vmem:[#allocation3 + $0x28] sm:$0xff] }
0x1249   :  { %1707 = vmatmul.mubr.msk.f32.vlgmr.msra.gmra.mrb[14].mxu1 %vm217_vm8, %v1238_v19 }
0x124a   :  { %1709 = vmatprep.mubr.msk.f32.mxu1 %vm217_vm8, %v1239_v20 }
0x124d   :  { %1710 = vmatmul.mubr.msk.f32.gmra.mrb[16].mxu1 %vm217_vm8, %v1240_v21 }
0x124e   :  { %1712 = vmatprep.mubr.msk.f32.mxu1 %vm217_vm8, %v1241_v22 }
0x1251   :  { %1713 = vmatmul.mubr.msk.f32.gmra.mrb[18].mxu1 %vm217_vm8, %v1242_v23 }
0x1314   :  { %v1091_v24 = vpop.f32.mrb[12].mxu1 }
0x1315   :  { %v1095_v26 = vadd.f32 %v1091_v24, %v2120_v17  ;;  %v1686_v27 = vpop.f32.mrb[13].mxu1 }
0x1317   :  { %v1446_v28 = vmul.f32 -1.442695, %v1095_v26 }
0x1319   :  { %1878 = vpow2.f32 %v1446_v28 }
0x131a   :  { %1880 = vtanh.f32 %v1095_v26 }
0x131c   :  { %v1708_v30 = vpop.f32.mrb[14].mxu1 }
0x131d   :  { %v1352_v31 = vadd.f32 %v1708_v30, %v2233_v29  ;;  %v1346_v7 = vpop.f32.mrb[15].mxu1 }
0x131e   :  { %v1347_v32 = vadd.f32 %v2233_v29, %v1346_v7 }
0x131f   :  { %1386 = vst [vmem:[#allocation4 + $0x8] sm:$0xff] %v1352_v31 }
0x1320   :  { %1385 = vst [vmem:[#allocation4] sm:$0xff] %v1347_v32  ;;  %v1711_v33 = vpop.f32.mrb[16].mxu1 }
0x1321   :  { %v1362_v34 = vadd.f32 %v1711_v33, %v2233_v29  ;;  %v1356_v17 = vpop.f32.mrb[17].mxu1 }
0x1322   :  { %v1357_v35 = vadd.f32 %v2233_v29, %v1356_v17 }
0x1323   :  { %v1879_v36 = vpop.eup %1878  ;;  %1388 = vst [vmem:[#allocation4 + $0x18] sm:$0xff] %v1362_v34 }
0x1324   :  { %v1100_v37 = vadd.f32 1.0, %v1879_v36  ;;  %1387 = vst [vmem:[#allocation4 + $0x10] sm:$0xff] %v1357_v35  ;;  %v1714_v38 = vpop.f32.mrb[18].mxu1  ;;  %v1881_v42 = vpop.eup %1880 }
0x1325   :  { %v1372_v39 = vadd.f32 %v1714_v38, %v2233_v29  ;;  %v1366_v40 = vpop.f32.mrb[19].mxu1 }
0x1326   :  { %1882 = vrcp.f32 %v1100_v37  ;;  %v1367_v41 = vadd.f32 %v2233_v29, %v1366_v40 }
0x1327   :  { %1390 = vst [vmem:[#allocation4 + $0x28] sm:$0xff] %v1372_v39 }
0x1328   :  { %1389 = vst [vmem:[#allocation4 + $0x20] sm:$0xff] %v1367_v41 }
0x1330   :  { %v1883_v43 = vpop.eup %1882 }
0x1331   :  { %v1103_v44 = vsel %vm2124_vm12, %v1881_v42, %v1883_v43 }
0x1332   :  { %1106 = vrot.lane.b32.xlu0 %v1103_v44, %s1923_s4  ;;  %v1104_v47 = vmul.f32 %v1103_v44, %v2204_v2 }
0x13a4   :  { %v1107_v45 = vpop.permute.xlu0 %1106 }
0x13a5   :  { %v1109_v46 = vmul.f32 %v1107_v45, %v1103_v44 }
0x13a7   :  { %1111 = vrot.lane.b32.xlu1 %v1109_v46, %s1924_s16 }
0x1419   :  { %v1112_v48 = vpop.permute.xlu1 %1111 }
0x141a   :  { %v1114_v13 = vadd.f32 %v1112_v48, %v1104_v47 }
0x141c   :  { %1884 = vtanh.f32 %v1114_v13 }
0x1426   :  { %v1885_v49 = vpop.eup %1884 }
0x1427   :  { %1117 = vrot.lane.b32.xlu0 %v1885_v49, %s1923_s4 }
0x1499   :  { %v1118_v51 = vpop.permute.xlu0 %1117 }
0x149a   :  { %v1120_v52 = vmul.f32 %v1118_v51, %v1103_v44 }
0x149c   :  { %1122 = vrot.lane.b32.xlu1 %v1120_v52, %s1924_s16 }
0x150e   :  { %v1123_v53 = vpop.permute.xlu1 %1122 }
0x150f   :  { %1126 = vst.msk [vmem:[#allocation3 + $0x30] sm:$0xff] %vm217_vm8, %v1123_v53  ;;  %1696 = vmatmul.mubr.msk.f32.vlgmr.msra.gmra.mrb[16].mxu0 %vm217_vm8, %v1123_v53 }
0x1516   :  { %v1243_v54 = vld [vmem:[#allocation3 + $0x30] sm:$0xff] }
0x1517   :  { %1715 = vmatprep.mubr.msk.f32.mxu1 %vm217_vm8, %v1243_v54 }
0x15e2   :  { %v1201_v56 = vpop.f32.mrb[16].mxu0 }
0x15e3   :  { %v1205_v57 = vadd.f32 %v1201_v56, %v2118_v15  ;;  %v1697_v58 = vpop.f32.mrb[17].mxu0 }
0x15e5   :  { %v1448_v59 = vmul.f32 -1.442695, %v1205_v57 }
0x15e7   :  { %1886 = vpow2.f32 %v1448_v59 }
0x15e8   :  { %1888 = vtanh.f32 %v1205_v57 }
0x15f1   :  { %v1887_v61 = vpop.eup %1886 }
0x15f2   :  { %v1210_v63 = vadd.f32 1.0, %v1887_v61  ;;  %v1889_v0 = vpop.eup %1888 }
0x15f4   :  { %1890 = vrcp.f32 %v1210_v63 }
0x15fe   :  { %v1891_v1 = vpop.eup %1890 }
0x15ff   :  { %v1213_v55 = vsel %vm2124_vm12, %v1889_v0, %v1891_v1 }
0x1600   :  { %1216 = vrot.lane.b32.xlu0 %v1213_v55, %s1923_s4  ;;  %v1214_v60 = vmul.f32 %v1213_v55, %v1114_v13 }
0x1672   :  { %v1217_v50 = vpop.permute.xlu0 %1216 }
0x1673   :  { %v1219_v62 = vmul.f32 %v1217_v50, %v1213_v55 }
0x1675   :  { %1221 = vrot.lane.b32.xlu1 %v1219_v62, %s1924_s16 }
0x16e7   :  { %v1222_v15 = vpop.permute.xlu1 %1221 }
0x16e8   :  { %v1224_v11 = vadd.f32 %v1222_v15, %v1214_v60 }
0x16ea   :  { %1892 = vtanh.f32 %v1224_v11 }
0x16f4   :  { %v1893_v2 = vpop.eup %1892 }
0x16f5   :  { %1227 = vrot.lane.b32.xlu0 %v1893_v2, %s1923_s4 }
0x1767   :  { %v1228_v3 = vpop.permute.xlu0 %1227 }
0x1768   :  { %v1230_v4 = vmul.f32 %v1228_v3, %v1213_v55 }
0x176a   :  { %1232 = vrot.lane.b32.xlu1 %v1230_v4, %s1924_s16 }
0x17dc   :  { %v1233_v5 = vpop.permute.xlu1 %1232 }
0x17dd   :  { %1236 = vst.msk [vmem:[#allocation3 + $0x38] sm:$0xff] %vm217_vm8, %v1233_v5 }
0x17e4   :  { %v1244_v25 = vld [vmem:[#allocation3 + $0x38] sm:$0xff] }
0x17e5   :  { %1716 = vmatmul.mubr.msk.f32.gmra.mrb[20].mxu1 %vm217_vm8, %v1244_v25 }
0x18b8   :  { %v1717_v6 = vpop.f32.mrb[20].mxu1 }
0x18b9   :  { %v1382_v8 = vadd.f32 %v1717_v6, %v2233_v29  ;;  %v1376_v9 = vpop.f32.mrb[21].mxu1 }
0x18ba   :  { %v1377_v10 = vadd.f32 %v2233_v29, %v1376_v9 }
0x18bb   :  { %1392 = vst [vmem:[#allocation4 + $0x38] sm:$0xff] %v1382_v8 }
0x18bc   :  { %1391 = vst [vmem:[#allocation4 + $0x30] sm:$0xff] %v1377_v10 }
0x18bd   :  { %1905 = shalt.err (!%p1902_p4)
}
0x18be   :  { %s1906_s30 = scalar_lea.hbm %s2281_s7, 1024 }
0x18bf   :  { %p1907_p5 = scmp.ne.s32.totalorder %s2281_s7, %s1906_s30  ;;  %p1910_p6 = scmp.lt.u32.totalorder %s1906_s30, %s2281_s7 }
0x18c1   :  { %p1912_p7 = pnand %p1910_p6, %p1907_p5 }
0x18c3   :  { %1915 = shalt.err (!%p1912_p7)
}
0x18c4   :  { %s1926_s10 = smov 128   ;;  %s1927_s11 = smov 8  }
0x18c5   :  { %1404 = dma.vmem_to_hbm [thread:$0]  %s1399_s26, 1024, %s2281_s7, [#allocation5], %s1926_s10, %s1926_s10, %s1927_s11  }
0x18c6   :  { %1916 = dma.done.wait [#allocation5], 1024  }
0x18c7   :  { %1917 = vsyncadd [#allocation5], 4294966272 }
0x18c8   :  { %1408 = vsyncpa [#allocation5], 1 }

</bundles_post_ra>
